<compile_context>
chip_gen: v7x
topology: tpu7x:2x2x1
jax: 0.10.0
libtpu: 0.0.40
codegen_flags: <defaults>
</compile_context>

<pallas_src>
import functools

import jax
import jax.numpy as jnp
from jax.experimental import pallas as pl
from jax.experimental.pallas import tpu as pltpu


LANE = 128  # TPU lane width; node and feature dims are padded to multiples of this.

_VMEM_SPEC = pl.BlockSpec(memory_space=pltpu.MemorySpace.VMEM)


def _rup(d):
    return ((d + LANE - 1) // LANE) * LANE


def _pad_last2(x, rows, cols):
    pad = [(0, 0)] * (x.ndim - 2) + [(0, rows - x.shape[-2]), (0, cols - x.shape[-1])]
    return jnp.pad(x, pad)


# ----------------------------- Pallas kernel ------------------------------- #

def fused_graphsage_kernel(x_ref, a_ref,
                           w_in_ref, b_in_ref,
                           w_cat_ref, b_sage_ref,
                           w_out_ref, b_out_ref,
                           o_ref):
    """Entire GraphSAGE forward, H kept resident on-chip (never written to HBM)."""
    f_hid = b_sage_ref.shape[-1]

    # --- input Linear:  h = x @ W_in + b_in  (bf16 MXU inputs, f32 accumulation) ---
    h = (jnp.dot(x_ref[...], w_in_ref[...], preferred_element_type=jnp.float32)
         + b_in_ref[...])
    # droplayer: identity in eval mode.

    n_layers = w_cat_ref.shape[0]
    for layer in range(n_layers):              # static unroll; static weight indexing
        h_bf = h.astype(jnp.bfloat16)
        # One fused 256-wide matmul: [self | neigh-pre-agg] paths share the LHS push.
        hw = jnp.dot(h_bf, w_cat_ref[layer, :, :],
                     preferred_element_type=jnp.float32)
        # hw[:, :f_hid] = h @ W_self ; hw[:, f_hid:] = h @ W_neigh  (lane-aligned slices).
        z = (hw[:, :f_hid]
             + jnp.dot(a_ref[...], hw[:, f_hid:].astype(jnp.bfloat16),
                       preferred_element_type=jnp.float32)
             + b_sage_ref[layer, :, :])        # f32 bias, added exactly once per layer
        h = jnp.where(z > 0, z, 0.01 * z)      # leaky_relu, negative slope 0.01

    # --- output Linear ---
    h_bf = h.astype(jnp.bfloat16)
    o_ref[...] = (jnp.dot(h_bf, w_out_ref[...], preferred_element_type=jnp.float32)
                  + b_out_ref[...])


# ------------------------------ Wrapper ------------------------------------ #

def prepare_params(params):
    """Pad + cast all x-independent weights ONCE (hoisted out of the per-call path)."""
    in_feats, n_hidden = params["w_in"].shape
    n_classes = params["w_out"].shape[1]
    layers = params["sage_layers"]

    f_in, f_hid, f_out = _rup(in_feats), _rup(n_hidden), _rup(n_classes)
    bf16 = jnp.bfloat16

    # Pad each weight to lane-dense shapes FIRST, then concat self|neigh along the output dim
    # so the split point lands exactly at f_hid (a multiple of 128).
    w_self_p = _pad_last2(jnp.stack([l["w_self"] for l in layers]), f_hid, f_hid)
    w_neigh_p = _pad_last2(jnp.stack([l["w_neigh"] for l in layers]), f_hid, f_hid)

    prep = {
        "w_in": _pad_last2(params["w_in"], f_in, f_hid).astype(bf16),
        "b_in": _pad_last2(params["b_in"], 1, f_hid),                        # f32
        "w_cat": jnp.concatenate([w_self_p, w_neigh_p], axis=-1).astype(bf16),
        "b_sage": _pad_last2(jnp.stack([l["b"] for l in layers]), 1, f_hid),  # f32
        "w_out": _pad_last2(params["w_out"], f_hid, f_out).astype(bf16),
        "b_out": _pad_last2(params["b_out"], 1, f_out),                       # f32
    }
    return prep, n_classes


@functools.partial(jax.jit, static_argnames=("n_classes",))
def graphsage_forward(features, a_norm, prep, *, n_classes):
    """Full GraphSAGE forward pass (matches the PyTorch module's forward, eval mode)."""
    n, _ = features.shape
    n_pad = _rup(n)
    f_in, f_hid = prep["w_in"].shape
    f_out = prep["w_out"].shape[1]
    n_layers = prep["w_cat"].shape[0]

    bf16 = jnp.bfloat16
    # Zero-padding is exact: padded columns of A are zero so junk values in padded H rows
    # never propagate into real rows; padded rows are sliced off below.
    x_p = _pad_last2(features, n_pad, f_in).astype(bf16)
    a_p = _pad_last2(a_norm, n_pad, n_pad).astype(bf16)

    operands = (x_p, a_p, prep["w_in"], prep["b_in"], prep["w_cat"],
                prep["b_sage"], prep["w_out"], prep["b_out"])

    flops = (2 * n_pad * f_in * f_hid
             + n_layers * (2 * n_pad * f_hid * (2 * f_hid) + 2 * n_pad * n_pad * f_hid)
             + 2 * n_pad * f_hid * f_out)
    bytes_accessed = (sum(int(o.size) * o.dtype.itemsize for o in operands)
                      + n_pad * f_out * 4)

    out_p = pl.pallas_call(
        fused_graphsage_kernel,
        out_shape=jax.ShapeDtypeStruct((n_pad, f_out), jnp.float32),
        in_specs=[_VMEM_SPEC] * len(operands),
        out_specs=_VMEM_SPEC,
        cost_estimate=pl.CostEstimate(flops=flops, transcendentals=0,
                                      bytes_accessed=bytes_accessed),
    )(*operands)
    return out_p[:n, :n_classes]


def reference_forward(features, a_norm, params):
    """Plain-JAX f32 reference (same math, for a numerical sanity check)."""
    h = features @ params["w_in"] + params["b_in"]
    for lp in params["sage_layers"]:
        neigh = a_norm @ h
        z = h @ lp["w_self"] + neigh @ lp["w_neigh"] + lp["b"]
        h = jnp.where(z > 0, z, 0.01 * z)
    return h @ params["w_out"] + params["b_out"]


# --------------------------- Parameter / graph setup ------------------------ #

def init_params(key, in_feats, n_hidden, n_classes, n_layers):
    keys = jax.random.split(key, 2 + 2 * n_layers)
    ki = iter(keys)
    scale = lambda fan_in: 1.0 / jnp.sqrt(jnp.float32(fan_in))

    params = {
        "w_in": jax.random.normal(next(ki), (in_feats, n_hidden), jnp.float32)
        * scale(in_feats),
        "b_in": jnp.zeros((1, n_hidden), jnp.float32),
        "w_out": jax.random.normal(next(ki), (n_hidden, n_classes), jnp.float32)
        * scale(n_hidden),
        "b_out": jnp.zeros((1, n_classes), jnp.float32),
        "sage_layers": [],
    }
    for _ in range(n_layers):
        params["sage_layers"].append(
            {
                "w_self": jax.random.normal(
                    next(ki), (n_hidden, n_hidden), jnp.float32) * scale(n_hidden),
                "w_neigh": jax.random.normal(
                    next(ki), (n_hidden, n_hidden), jnp.float32) * scale(n_hidden),
                "b": jnp.zeros((1, n_hidden), jnp.float32),
            }
        )
    return params


def build_normalized_adjacency(key, n_nodes, avg_degree=4):
    """Deterministic random directed graph -> dense row-normalized adjacency
    (row i averages over in-neighbors of node i; rows with no edges stay 0)."""
    p = avg_degree / n_nodes
    adj = (jax.random.uniform(key, (n_nodes, n_nodes)) < p).astype(jnp.float32)
    adj = adj * (1.0 - jnp.eye(n_nodes, dtype=jnp.float32))  # no self loops
    deg = jnp.sum(adj, axis=1, keepdims=True)
    a_norm = jnp.where(deg > 0, adj / jnp.maximum(deg, 1.0), 0.0)
    return a_norm


# ---------------------------------- Main ------------------------------------ #

if __name__ == "__main__":
    N_NODES = 64
    IN_FEATS = 16
    N_HIDDEN = 32
    N_CLASSES = 8
    N_LAYERS = 2

    root = jax.random.PRNGKey(0)
    k_feat, k_graph, k_params = jax.random.split(root, 3)

    features = jax.random.normal(k_feat, (N_NODES, IN_FEATS), jnp.float32)
    a_norm = build_normalized_adjacency(k_graph, N_NODES)
    params = init_params(k_params, IN_FEATS, N_HIDDEN, N_CLASSES, N_LAYERS)

    # Weight padding / casting done once (not per forward call).
    prep, n_classes = prepare_params(params)

    out = graphsage_forward(features, a_norm, prep, n_classes=n_classes)
    out = jax.block_until_ready(out)

    assert out.shape == (N_NODES, N_CLASSES)
    assert out.dtype == jnp.float32

    # Sanity check vs. plain-JAX f32 reference (bf16 MXU inputs -> loose tolerance).
    ref = reference_forward(features, a_norm, params)
    max_err = float(jnp.max(jnp.abs(out - ref)))
    assert bool(jnp.allclose(out, ref, atol=1e-1, rtol=1e-1)), max_err

    print("KERNEL_OK")
</pallas_src>

<mosaic_0001>
module attributes {stable_mosaic.version = 11 : i64} {
  func.func @fused_graphsage_kernel(%arg0: memref<128x128xbf16, #tpu.memory_space<vmem>>, %arg1: memref<128x128xbf16, #tpu.memory_space<vmem>>, %arg2: memref<128x128xbf16, #tpu.memory_space<vmem>>, %arg3: memref<1x128xf32, #tpu.memory_space<vmem>>, %arg4: memref<2x128x256xbf16, #tpu.memory_space<vmem>>, %arg5: memref<2x1x128xf32, #tpu.memory_space<vmem>>, %arg6: memref<128x128xbf16, #tpu.memory_space<vmem>>, %arg7: memref<1x128xf32, #tpu.memory_space<vmem>>, %arg8: memref<128x128xf32, #tpu.memory_space<vmem>>) attributes {dimension_semantics = [], scalar_prefetch = 0 : i64, scratch_operands = 0 : i64, tpu.core_type = #tpu.core_type<tc>} {
    %c0 = arith.constant 0 : index
    %c0_0 = arith.constant 0 : index
    %0 = vector.load %arg0[%c0, %c0_0] : memref<128x128xbf16, #tpu.memory_space<vmem>>, vector<128x128xbf16>
    %c0_1 = arith.constant 0 : index
    %c0_2 = arith.constant 0 : index
    %1 = vector.load %arg2[%c0_1, %c0_2] : memref<128x128xbf16, #tpu.memory_space<vmem>>, vector<128x128xbf16>
    %cst = arith.constant dense<0.000000e+00> : vector<128x128xf32>
    %2 = tpu.matmul %0, %1, %cst {dimension_numbers = #tpu.dot_dimension_numbers<[1], [0], [0], [1], [0, 0, 1, 1], [], []>} : vector<128x128xbf16>, vector<128x128xbf16>, vector<128x128xf32> -> vector<128x128xf32>
    %c0_3 = arith.constant 0 : index
    %c0_4 = arith.constant 0 : index
    %3 = vector.load %arg3[%c0_3, %c0_4] : memref<1x128xf32, #tpu.memory_space<vmem>>, vector<1x128xf32>
    %4 = vector.broadcast %3 : vector<1x128xf32> to vector<128x128xf32>
    %5 = arith.addf %2, %4 : vector<128x128xf32>
    %6 = arith.truncf %5 : vector<128x128xf32> to vector<128x128xbf16>
    %c0_5 = arith.constant 0 : index
    %c0_6 = arith.constant 0 : index
    %c0_7 = arith.constant 0 : index
    %7 = vector.load %arg4[%c0_5, %c0_6, %c0_7] : memref<2x128x256xbf16, #tpu.memory_space<vmem>>, vector<1x128x256xbf16>
    %8 = vector.shape_cast %7 : vector<1x128x256xbf16> to vector<128x256xbf16>
    %cst_8 = arith.constant dense<0.000000e+00> : vector<128x256xf32>
    %9 = tpu.matmul %6, %8, %cst_8 {dimension_numbers = #tpu.dot_dimension_numbers<[1], [0], [0], [1], [0, 0, 1, 1], [], []>} : vector<128x128xbf16>, vector<128x256xbf16>, vector<128x256xf32> -> vector<128x256xf32>
    %10 = vector.extract_strided_slice %9 {offsets = [0, 0], sizes = [128, 128], strides = [1, 1]} : vector<128x256xf32> to vector<128x128xf32>
    %c0_9 = arith.constant 0 : index
    %c0_10 = arith.constant 0 : index
    %11 = vector.load %arg1[%c0_9, %c0_10] : memref<128x128xbf16, #tpu.memory_space<vmem>>, vector<128x128xbf16>
    %12 = vector.extract_strided_slice %9 {offsets = [0, 128], sizes = [128, 128], strides = [1, 1]} : vector<128x256xf32> to vector<128x128xf32>
    %13 = arith.truncf %12 : vector<128x128xf32> to vector<128x128xbf16>
    %cst_11 = arith.constant dense<0.000000e+00> : vector<128x128xf32>
    %14 = tpu.matmul %11, %13, %cst_11 {dimension_numbers = #tpu.dot_dimension_numbers<[1], [0], [0], [1], [0, 0, 1, 1], [], []>} : vector<128x128xbf16>, vector<128x128xbf16>, vector<128x128xf32> -> vector<128x128xf32>
    %15 = arith.addf %10, %14 : vector<128x128xf32>
    %c0_12 = arith.constant 0 : index
    %c0_13 = arith.constant 0 : index
    %c0_14 = arith.constant 0 : index
    %16 = vector.load %arg5[%c0_12, %c0_13, %c0_14] : memref<2x1x128xf32, #tpu.memory_space<vmem>>, vector<1x1x128xf32>
    %17 = vector.shape_cast %16 : vector<1x1x128xf32> to vector<1x128xf32>
    %18 = vector.broadcast %17 : vector<1x128xf32> to vector<128x128xf32>
    %19 = arith.addf %15, %18 : vector<128x128xf32>
    %cst_15 = arith.constant 0.000000e+00 : f32
    %20 = vector.broadcast %cst_15 : f32 to vector<128x128xf32>
    %21 = arith.cmpf ogt, %19, %20 : vector<128x128xf32>
    %cst_16 = arith.constant 0.00999999977 : f32
    %22 = vector.broadcast %cst_16 : f32 to vector<128x128xf32>
    %23 = arith.mulf %22, %19 : vector<128x128xf32>
    %24 = arith.select %21, %19, %23 : vector<128x128xi1>, vector<128x128xf32>
    %25 = arith.truncf %24 : vector<128x128xf32> to vector<128x128xbf16>
    %c1 = arith.constant 1 : index
    %c0_17 = arith.constant 0 : index
    %c0_18 = arith.constant 0 : index
    %26 = vector.load %arg4[%c1, %c0_17, %c0_18] : memref<2x128x256xbf16, #tpu.memory_space<vmem>>, vector<1x128x256xbf16>
    %27 = vector.shape_cast %26 : vector<1x128x256xbf16> to vector<128x256xbf16>
    %cst_19 = arith.constant dense<0.000000e+00> : vector<128x256xf32>
    %28 = tpu.matmul %25, %27, %cst_19 {dimension_numbers = #tpu.dot_dimension_numbers<[1], [0], [0], [1], [0, 0, 1, 1], [], []>} : vector<128x128xbf16>, vector<128x256xbf16>, vector<128x256xf32> -> vector<128x256xf32>
    %29 = vector.extract_strided_slice %28 {offsets = [0, 0], sizes = [128, 128], strides = [1, 1]} : vector<128x256xf32> to vector<128x128xf32>
    %c0_20 = arith.constant 0 : index
    %c0_21 = arith.constant 0 : index
    %30 = vector.load %arg1[%c0_20, %c0_21] : memref<128x128xbf16, #tpu.memory_space<vmem>>, vector<128x128xbf16>
    %31 = vector.extract_strided_slice %28 {offsets = [0, 128], sizes = [128, 128], strides = [1, 1]} : vector<128x256xf32> to vector<128x128xf32>
    %32 = arith.truncf %31 : vector<128x128xf32> to vector<128x128xbf16>
    %cst_22 = arith.constant dense<0.000000e+00> : vector<128x128xf32>
    %33 = tpu.matmul %30, %32, %cst_22 {dimension_numbers = #tpu.dot_dimension_numbers<[1], [0], [0], [1], [0, 0, 1, 1], [], []>} : vector<128x128xbf16>, vector<128x128xbf16>, vector<128x128xf32> -> vector<128x128xf32>
    %34 = arith.addf %29, %33 : vector<128x128xf32>
    %c1_23 = arith.constant 1 : index
    %c0_24 = arith.constant 0 : index
    %c0_25 = arith.constant 0 : index
    %35 = vector.load %arg5[%c1_23, %c0_24, %c0_25] : memref<2x1x128xf32, #tpu.memory_space<vmem>>, vector<1x1x128xf32>
    %36 = vector.shape_cast %35 : vector<1x1x128xf32> to vector<1x128xf32>
    %37 = vector.broadcast %36 : vector<1x128xf32> to vector<128x128xf32>
    %38 = arith.addf %34, %37 : vector<128x128xf32>
    %cst_26 = arith.constant 0.000000e+00 : f32
    %39 = vector.broadcast %cst_26 : f32 to vector<128x128xf32>
    %40 = arith.cmpf ogt, %38, %39 : vector<128x128xf32>
    %cst_27 = arith.constant 0.00999999977 : f32
    %41 = vector.broadcast %cst_27 : f32 to vector<128x128xf32>
    %42 = arith.mulf %41, %38 : vector<128x128xf32>
    %43 = arith.select %40, %38, %42 : vector<128x128xi1>, vector<128x128xf32>
    %44 = arith.truncf %43 : vector<128x128xf32> to vector<128x128xbf16>
    %c0_28 = arith.constant 0 : index
    %c0_29 = arith.constant 0 : index
    %45 = vector.load %arg6[%c0_28, %c0_29] : memref<128x128xbf16, #tpu.memory_space<vmem>>, vector<128x128xbf16>
    %cst_30 = arith.constant dense<0.000000e+00> : vector<128x128xf32>
    %46 = tpu.matmul %44, %45, %cst_30 {dimension_numbers = #tpu.dot_dimension_numbers<[1], [0], [0], [1], [0, 0, 1, 1], [], []>} : vector<128x128xbf16>, vector<128x128xbf16>, vector<128x128xf32> -> vector<128x128xf32>
    %c0_31 = arith.constant 0 : index
    %c0_32 = arith.constant 0 : index
    %47 = vector.load %arg7[%c0_31, %c0_32] : memref<1x128xf32, #tpu.memory_space<vmem>>, vector<1x128xf32>
    %48 = vector.broadcast %47 : vector<1x128xf32> to vector<128x128xf32>
    %49 = arith.addf %46, %48 : vector<128x128xf32>
    %c0_33 = arith.constant 0 : index
    %c0_34 = arith.constant 0 : index
    %50 = vector.load %arg8[%c0_33, %c0_34] : memref<128x128xf32, #tpu.memory_space<vmem>>, vector<128x128xf32>
    tpu.vector_store %arg8[%c0_33, %c0_34], %49 {strides = array<i32>} : memref<128x128xf32, #tpu.memory_space<vmem>>, vector<128x128xf32>,
    return
  }
}

</mosaic_0001>

<bundles_post_ra>
// kernel: graphsage_forward.1
= control target key start
LH: loop header
LB: loop body
LE: loop exit
PB: predicated region body
PF: predicated region fallthrough
CT: control target
= control target key end

     0   :  { %13 = vsyncpa [#allocation3], 0  ;;  %s1742_s27 = smov [#allocation2]   ;;  %s2207_s0 = inlined_call_operand.vmem [shape: bf16[128,128], index: 0, kind: input, shape index: {}]   ;;  %s2208_s1 = inlined_call_operand.vmem [shape: bf16[128,128], index: 1, kind: input, shape index: {}]   ;;  %s2209_s2 = inlined_call_operand.vmem [shape: bf16[128,128], index: 2, kind: input, shape index: {}]   ;;  %s2210_s3 = inlined_call_operand.vmem [shape: f32[1,128], index: 3, kind: input, shape index: {}]   ;;  %s2211_s4 = inlined_call_operand.vmem [shape: bf16[2,128,256], index: 4, kind: input, shape index: {}]   ;;  %s2212_s5 = inlined_call_operand.vmem [shape: f32[2,1,128], index: 5, kind: input, shape index: {}]   ;;  %s2213_s6 = inlined_call_operand.hbm [shape: bf16[128,128], index: 6, kind: input, shape index: {}]   ;;  %s2214_s7 = inlined_call_operand.vmem [shape: f32[1,128], index: 7, kind: input, shape index: {}]   ;;  %s2215_s8 = inlined_call_operand.vmem [shape: f32[128,128], index: 8, kind: output, shape index: {}]  }
   0x1   :  { %s31_s28 = sshll.u32 %s1742_s27, 4  ;;  %s1718_s9 = scalar_lea.hbm %s2213_s6, 1024  ;;  %s32_s28 = int_to_ptr.vmem [resolvable:$true] %s31_s28 }
   0x2   :  { %p1719_p0 = scmp.ne.s32.totalorder %s2213_s6, %s1718_s9  ;;  %p1722_p1 = scmp.lt.u32.totalorder %s1718_s9, %s2213_s6 }
   0x4   :  { %p1724_p2 = pnand %p1722_p1, %p1719_p0 }
   0x6   :  { %1727 = shalt.err (!%p1724_p2)
}
   0x7   :  { %s1728_s14 = scalar_lea.vmem %s32_s28, 1024  ;;  %p1733_p4 = scmp.lt.s32.totalorder %s32_s28, %s32_s28 }
   0x8   :  { %p1729_p3 = scmp.ne.s32.totalorder %s32_s28, %s1728_s14  ;;  %p1734_p5 = scmp.lt.s32.totalorder %s1728_s14, %s1728_s14 }
   0xa   :  { %p1735_p6 = por %p1734_p5, %p1733_p4 }
   0xc   :  { %p1736_p7 = pnand %p1735_p6, %p1729_p3 }
   0xe   :  { %1739 = shalt.err (!%p1736_p7)
}
   0xf   :  { %s1743_s15 = smov 64   ;;  %s1744_s16 = smov 4  }
  0x10   :  { %37 = dma.hbm_to_vmem [thread:$0]  %s2213_s6, 1024, %s32_s28, [#allocation3], %s1743_s15, %s1743_s15, %s1744_s16  }
  0x11   :  { %1740 = dma.done.wait [#allocation3], 1024  }
  0x12   :  { %1741 = vsyncadd [#allocation3], 4294966272  ;;  %v1638_v0 = vld [vmem:[%s2209_s2] sm:$0xff]   ;;  %v1639_v1 = vld [vmem:[%s2209_s2 + $0x8] sm:$0xff]   ;;  %v1745_v32 = vmov 0  }
  0x13   :  { %1506 = vmatprep.subr.bf16.mxu0 %v1638_v0  ;;  %v1640_v2 = vld [vmem:[%s2209_s2 + $0x10] sm:$0xff]   ;;  %v1641_v3 = vld [vmem:[%s2209_s2 + $0x18] sm:$0xff]   ;;  %v1646_v4 = vld [vmem:[%s2207_s0] sm:$0xff]   ;;  %412 = vmatprep.mubr.bf16.mxu1 %v1745_v32 }
  0x14   :  { %1507 = vmatpush3.bf16.msra.mxu0 %v1638_v0  ;;  %1522 = vmatprep.mubr.bf16.mxu0 %v1646_v4  ;;  %v1642_v5 = vld [vmem:[%s2209_s2 + $0x20] sm:$0xff]   ;;  %v1643_v6 = vld [vmem:[%s2209_s2 + $0x28] sm:$0xff]   ;;  %v1657_v9 = vld [vmem:[%s2211_s4 + $0x14] ss:$8 sps:$4 sm:$0xff]  }
  0x15   :  { %1508 = vmatprep.subr.bf16.mxu0 %v1639_v1  ;;  %v1654_v7 = vld [vmem:[%s2211_s4 + $0x4] ss:$8 sps:$4 sm:$0xff]   ;;  %v1656_v8 = vld [vmem:[%s2211_s4] ss:$8 sps:$4 sm:$0xff]   ;;  %v1644_v10 = vld [vmem:[%s2209_s2 + $0x30] sm:$0xff]  }
  0x16   :  { %380 = vmatprep.subr.bf16.mxu1 %v1654_v7  ;;  %v1659_v11 = vld [vmem:[%s2211_s4 + $0x10] ss:$8 sps:$4 sm:$0xff]   ;;  %v1660_v12 = vld [vmem:[%s2211_s4 + $0x24] ss:$8 sps:$4 sm:$0xff]   ;;  %v1662_v14 = vld [vmem:[%s2211_s4 + $0x20] ss:$8 sps:$4 sm:$0xff]  }
  0x17   :  { %381 = vmatpush1.bf16.msra.mxu1 %v1656_v8  ;;  %v1645_v13 = vld [vmem:[%s2209_s2 + $0x38] sm:$0xff]   ;;  %v1666_v17 = vld [vmem:[%s2211_s4 + $0x44] ss:$8 sps:$4 sm:$0xff]   ;;  %v1648_v19 = vld [vmem:[%s2207_s0 + $0x10] sm:$0xff]  }
  0x18   :  { %1509 = vmatpush3.bf16.msra.mxu0 %v1639_v1  ;;  %382 = vmatprep.subr.bf16.mxu1 %v1657_v9  ;;  %v1663_v15 = vld [vmem:[%s2211_s4 + $0x34] ss:$8 sps:$4 sm:$0xff]   ;;  %v1665_v16 = vld [vmem:[%s2211_s4 + $0x30] ss:$8 sps:$4 sm:$0xff]   ;;  %v1647_v18 = vld [vmem:[%s2207_s0 + $0x8] sm:$0xff]  }
  0x19   :  { %1510 = vmatprep.subr.bf16.mxu0 %v1640_v2  ;;  %v1668_v20 = vld [vmem:[%s2211_s4 + $0x40] ss:$8 sps:$4 sm:$0xff]   ;;  %v1669_v21 = vld [vmem:[%s2211_s4 + $0x54] ss:$8 sps:$4 sm:$0xff]   ;;  %v1671_v22 = vld [vmem:[%s2211_s4 + $0x50] ss:$8 sps:$4 sm:$0xff]  }
  0x1a   :  { %v1649_v23 = vld [vmem:[%s2207_s0 + $0x18] sm:$0xff]   ;;  %v1650_v24 = vld [vmem:[%s2207_s0 + $0x20] sm:$0xff]   ;;  %v1651_v25 = vld [vmem:[%s2207_s0 + $0x28] sm:$0xff]  }
  0x1b   :  { %383 = vmatpush1.bf16.msra.mxu1 %v1659_v11  ;;  %v1652_v26 = vld [vmem:[%s2207_s0 + $0x30] sm:$0xff]   ;;  %v1653_v27 = vld [vmem:[%s2207_s0 + $0x38] sm:$0xff]   ;;  %v1672_v28 = vld [vmem:[%s2211_s4 + $0x64] ss:$8 sps:$4 sm:$0xff]  }
  0x1c   :  { %1511 = vmatpush3.bf16.msra.mxu0 %v1640_v2  ;;  %384 = vmatprep.subr.bf16.mxu1 %v1660_v12  ;;  %v1674_v29 = vld [vmem:[%s2211_s4 + $0x60] ss:$8 sps:$4 sm:$0xff]   ;;  %v1675_v30 = vld [vmem:[%s2211_s4 + $0x74] ss:$8 sps:$4 sm:$0xff]   ;;  %v1677_v31 = vld [vmem:[%s2211_s4 + $0x70] ss:$8 sps:$4 sm:$0xff]  }
  0x1d   :  { %1512 = vmatprep.subr.bf16.mxu0 %v1641_v3  ;;  %v1357_v34 = vld [vmem:[%s2210_s3] ss:$0 sm:$0xff] }
  0x1f   :  { %385 = vmatpush1.bf16.msra.mxu1 %v1662_v14 }
  0x20   :  { %1513 = vmatpush3.bf16.msra.mxu0 %v1641_v3  ;;  %386 = vmatprep.subr.bf16.mxu1 %v1663_v15 }
  0x21   :  { %1514 = vmatprep.subr.bf16.mxu0 %v1642_v5 }
  0x23   :  { %387 = vmatpush1.bf16.msra.mxu1 %v1665_v16 }
  0x24   :  { %1515 = vmatpush3.bf16.msra.mxu0 %v1642_v5  ;;  %388 = vmatprep.subr.bf16.mxu1 %v1666_v17 }
  0x25   :  { %1516 = vmatprep.subr.bf16.mxu0 %v1643_v6 }
  0x27   :  { %389 = vmatpush1.bf16.msra.mxu1 %v1668_v20 }
  0x28   :  { %1517 = vmatpush3.bf16.msra.mxu0 %v1643_v6  ;;  %390 = vmatprep.subr.bf16.mxu1 %v1669_v21 }
  0x29   :  { %1518 = vmatprep.subr.bf16.mxu0 %v1644_v10 }
  0x2b   :  { %391 = vmatpush1.bf16.msra.mxu1 %v1671_v22 }
  0x2c   :  { %1519 = vmatpush3.bf16.msra.mxu0 %v1644_v10  ;;  %392 = vmatprep.subr.bf16.mxu1 %v1672_v28  ;;  %v1678_v10 = vld [vmem:[%s2208_s1] sm:$0xff]  }
  0x2d   :  { %1520 = vmatprep.subr.bf16.mxu0 %v1645_v13 }
  0x2f   :  { %393 = vmatpush1.bf16.msra.mxu1 %v1674_v29 }
  0x30   :  { %1521 = vmatpush3.bf16.msra.mxu0 %v1645_v13  ;;  %394 = vmatprep.subr.bf16.mxu1 %v1675_v30 }
  0x33   :  { %1523 = vmatmul.mubr.bf16.vlgmr.msra.gmra.mrb[0].mxu0 %v1647_v18  ;;  %395 = vmatpush1.bf16.msra.mxu1 %v1677_v31 }
  0x34   :  { %1526 = vmatprep.mubr.bf16.mxu0 %v1648_v19 }
  0x3b   :  { %1527 = vmatmul.mubr.bf16.gmra.mrb[4].mxu0 %v1649_v23 }
  0x3c   :  { %1530 = vmatprep.mubr.bf16.mxu0 %v1650_v24 }
  0x43   :  { %1531 = vmatmul.mubr.bf16.gmra.mrb[8].mxu0 %v1651_v25 }
  0x44   :  { %1534 = vmatprep.mubr.bf16.mxu0 %v1652_v26 }
  0x4b   :  { %1535 = vmatmul.mubr.bf16.gmra.mrb[12].mxu0 %v1653_v27 }
  0x4c   :  { %1554 = vmatprep.mubr.bf16.mxu0 %v1678_v10 }
 0x106   :  { %v1524_v33 = vpop.f32.mrb[0].mxu0 }
 0x107   :  { %v213_v35 = vpop.f32.mrb[1].mxu0  ;;  %v222_v37 = vadd.f32 %v1524_v33, %v1357_v34 }
 0x108   :  { %v1525_v36 = vpop.f32.mrb[2].mxu0  ;;  %v214_v40 = vadd.f32 %v1357_v34, %v213_v35 }
 0x109   :  { %v225_v38 = vadd.f32 %v1525_v36, %v1357_v34  ;;  %v216_v39 = vpop.f32.mrb[3].mxu0 }
 0x10a   :  { %v217_v41 = vadd.f32 %v1357_v34, %v216_v39 }
 0x10b   :  { %v277_v42 = vpack.c.bf16 %v225_v38, %v222_v37 }
 0x10c   :  { %v276_v43 = vpack.c.bf16 %v217_v41, %v214_v40 }
 0x10e   :  { %413 = vmatmul.mubr.bf16.vlgmr.msra.gmra.mrb[0].mxu1 %v276_v43  ;;  %v1528_v44 = vpop.f32.mrb[4].mxu0 }
 0x10f   :  { %v238_v45 = vadd.f32 %v1528_v44, %v1357_v34  ;;  %v229_v46 = vpop.f32.mrb[5].mxu0  ;;  %422 = vmatprep.mubr.bf16.mxu1 %v1745_v32 }
 0x110   :  { %v230_v47 = vadd.f32 %v1357_v34, %v229_v46  ;;  %v1529_v48 = vpop.f32.mrb[6].mxu0 }
 0x111   :  { %v241_v49 = vadd.f32 %v1529_v48, %v1357_v34  ;;  %v232_v50 = vpop.f32.mrb[7].mxu0 }
 0x112   :  { %v233_v51 = vadd.f32 %v1357_v34, %v232_v50 }
 0x113   :  { %v279_v52 = vpack.c.bf16 %v241_v49, %v238_v45 }
 0x114   :  { %v278_v53 = vpack.c.bf16 %v233_v51, %v230_v47 }
 0x116   :  { %423 = vmatmul.mubr.bf16.gmra.mrb[4].mxu1 %v277_v42  ;;  %v1532_v54 = vpop.f32.mrb[8].mxu0 }
 0x117   :  { %432 = vmatprep.mubr.bf16.mxu1 %v1745_v32  ;;  %v254_v55 = vadd.f32 %v1532_v54, %v1357_v34  ;;  %v245_v56 = vpop.f32.mrb[9].mxu0  ;;  %v1956_v54 = vld [vmem:[%s2208_s1 + $0x10] sm:$0xff]  }
 0x118   :  { %v246_v57 = vadd.f32 %v1357_v34, %v245_v56  ;;  %v1533_v58 = vpop.f32.mrb[10].mxu0  ;;  %v1691_v56 = vld [vmem:[%s2211_s4 + $0x94] ss:$8 sps:$4 sm:$0xff]  }
 0x119   :  { %v257_v59 = vadd.f32 %v1533_v58, %v1357_v34  ;;  %v248_v60 = vpop.f32.mrb[11].mxu0  ;;  %v1694_v58 = vld [vmem:[%s2211_s4 + $0xa4] ss:$8 sps:$4 sm:$0xff]  }
 0x11a   :  { %v249_v61 = vadd.f32 %v1357_v34, %v248_v60  ;;  %v1980_v60 = vld [vmem:[%s2208_s1 + $0x20] sm:$0xff]  }
 0x11b   :  { %v281_v62 = vpack.c.bf16 %v257_v59, %v254_v55  ;;  %v1686_v55 = vld [vmem:[%s2211_s4 + $0x80] ss:$8 sps:$4 sm:$0xff]   ;;  %v1975_v59 = vld [vmem:[%s2208_s1 + $0x18] sm:$0xff]  }
 0x11c   :  { %v280_v63 = vpack.c.bf16 %v249_v61, %v246_v57  ;;  %v1689_v57 = vld [vmem:[%s2211_s4 + $0x90] ss:$8 sps:$4 sm:$0xff]   ;;  %v1692_v61 = vld [vmem:[%s2211_s4 + $0xa0] ss:$8 sps:$4 sm:$0xff]  }
 0x11e   :  { %433 = vmatmul.mubr.bf16.gmra.mrb[8].mxu1 %v278_v53  ;;  %v1536_v0 = vpop.f32.mrb[12].mxu0  ;;  %v1951_v53 = vld [vmem:[%s2208_s1 + $0x8] sm:$0xff]  }
 0x11f   :  { %442 = vmatprep.mubr.bf16.mxu1 %v1745_v32  ;;  %v270_v1 = vadd.f32 %v1536_v0, %v1357_v34  ;;  %v261_v2 = vpop.f32.mrb[13].mxu0  ;;  %v1700_v0 = vld [vmem:[%s2211_s4 + $0xc4] ss:$8 sps:$4 sm:$0xff]  }
 0x120   :  { %v262_v3 = vadd.f32 %v1357_v34, %v261_v2  ;;  %v1537_v4 = vpop.f32.mrb[14].mxu0  ;;  %v2004_v2 = vld [vmem:[%s2208_s1 + $0x30] sm:$0xff]  }
 0x121   :  { %v273_v5 = vadd.f32 %v1537_v4, %v1357_v34  ;;  %v264_v6 = vpop.f32.mrb[15].mxu0  ;;  %v2014_v4 = vld [vmem:[%s2208_s1 + $0x38] sm:$0xff]  }
 0x122   :  { %v265_v7 = vadd.f32 %v1357_v34, %v264_v6  ;;  %v1701_v6 = vld [vmem:[%s2211_s4 + $0xd0] ss:$8 sps:$4 sm:$0xff]  }
 0x123   :  { %v283_v8 = vpack.c.bf16 %v273_v5, %v270_v1  ;;  %v1999_v1 = vld [vmem:[%s2208_s1 + $0x28] sm:$0xff]   ;;  %v1703_v5 = vld [vmem:[%s2211_s4 + $0xd4] ss:$8 sps:$4 sm:$0xff]  }
 0x124   :  { %v282_v9 = vpack.c.bf16 %v265_v7, %v262_v3  ;;  %v1698_v3 = vld [vmem:[%s2211_s4 + $0xc0] ss:$8 sps:$4 sm:$0xff]   ;;  %v1706_v7 = vld [vmem:[%s2211_s4 + $0xe4] ss:$8 sps:$4 sm:$0xff]  }
 0x126   :  { %443 = vmatmul.mubr.bf16.gmra.mrb[12].mxu1 %v279_v52  ;;  %v1688_v52 = vld [vmem:[%s2211_s4 + $0x84] ss:$8 sps:$4 sm:$0xff]  }
 0x127   :  { %452 = vmatprep.mubr.bf16.mxu1 %v1745_v32 }
 0x12e   :  { %453 = vmatmul.mubr.bf16.gmra.mrb[16].mxu1 %v280_v63  ;;  %v1695_v63 = vld [vmem:[%s2211_s4 + $0xb0] ss:$8 sps:$4 sm:$0xff]  }
 0x12f   :  { %462 = vmatprep.mubr.bf16.mxu1 %v1745_v32 }
 0x136   :  { %463 = vmatmul.mubr.bf16.gmra.mrb[20].mxu1 %v281_v62  ;;  %v1697_v62 = vld [vmem:[%s2211_s4 + $0xb4] ss:$8 sps:$4 sm:$0xff]  }
 0x137   :  { %472 = vmatprep.mubr.bf16.mxu1 %v1745_v32 }
 0x13e   :  { %473 = vmatmul.mubr.bf16.gmra.mrb[24].mxu1 %v282_v9  ;;  %v1709_v9 = vld [vmem:[%s2211_s4 + $0xf4] ss:$8 sps:$4 sm:$0xff]  }
 0x13f   :  { %482 = vmatprep.mubr.bf16.mxu1 %v1745_v32 }
 0x146   :  { %483 = vmatmul.mubr.bf16.gmra.mrb[28].mxu1 %v283_v8  ;;  %v1704_v8 = vld [vmem:[%s2211_s4 + $0xe0] ss:$8 sps:$4 sm:$0xff]  }
 0x147   :  { %1586 = vmatprep.mubr.bf16.mxu1 %v1678_v10  ;;  %v1707_v10 = vld [vmem:[%s2211_s4 + $0xf0] ss:$8 sps:$4 sm:$0xff]  }
 0x1e1   :  { %v1913_v11 = vpop.f32.mrb[0].mxu1 }
 0x1e2   :  { %v416_v12 = vpop.f32.mrb[1].mxu1 }
 0x1e3   :  { %v1915_v13 = vpop.f32.mrb[2].mxu1 }
 0x1e4   :  { %v420_v14 = vpop.f32.mrb[3].mxu1 }
 0x1e5   :  { %v509_v15 = vpack.c.bf16 %v420_v14, %v416_v12  ;;  %v2039_v14 = vld [vmem:[%s2212_s5] ss:$0 sm:$0xff] }
 0x1e7   :  { %1538 = vmatprep.subr.bf16.mxu0 %v509_v15 }
 0x1e8   :  { %1539 = vmatpush3.bf16.msra.mxu0 %v509_v15 }
 0x1e9   :  { %v1917_v16 = vpop.f32.mrb[4].mxu1 }
 0x1ea   :  { %v426_v17 = vpop.f32.mrb[5].mxu1 }
 0x1eb   :  { %v1919_v18 = vpop.f32.mrb[6].mxu1 }
 0x1ec   :  { %v430_v19 = vpop.f32.mrb[7].mxu1 }
 0x1ed   :  { %v510_v20 = vpack.c.bf16 %v430_v19, %v426_v17 }
 0x1ef   :  { %1540 = vmatprep.subr.bf16.mxu0 %v510_v20 }
 0x1f0   :  { %1541 = vmatpush3.bf16.msra.mxu0 %v510_v20 }
 0x1f1   :  { %v1921_v21 = vpop.f32.mrb[8].mxu1 }
 0x1f2   :  { %v436_v22 = vpop.f32.mrb[9].mxu1 }
 0x1f3   :  { %v1923_v23 = vpop.f32.mrb[10].mxu1 }
 0x1f4   :  { %v440_v24 = vpop.f32.mrb[11].mxu1 }
 0x1f5   :  { %v511_v25 = vpack.c.bf16 %v440_v24, %v436_v22 }
 0x1f7   :  { %1542 = vmatprep.subr.bf16.mxu0 %v511_v25 }
 0x1f8   :  { %1543 = vmatpush3.bf16.msra.mxu0 %v511_v25 }
 0x1f9   :  { %v1925_v26 = vpop.f32.mrb[12].mxu1 }
 0x1fa   :  { %v446_v27 = vpop.f32.mrb[13].mxu1 }
 0x1fb   :  { %v1927_v28 = vpop.f32.mrb[14].mxu1 }
 0x1fc   :  { %v450_v29 = vpop.f32.mrb[15].mxu1 }
 0x1fd   :  { %v512_v30 = vpack.c.bf16 %v450_v29, %v446_v27 }
 0x1ff   :  { %1544 = vmatprep.subr.bf16.mxu0 %v512_v30 }
 0x200   :  { %1545 = vmatpush3.bf16.msra.mxu0 %v512_v30 }
 0x201   :  { %v1929_v31 = vpop.f32.mrb[16].mxu1 }
 0x202   :  { %v456_v33 = vpop.f32.mrb[17].mxu1 }
 0x203   :  { %v1931_v34 = vpop.f32.mrb[18].mxu1 }
 0x204   :  { %v460_v35 = vpop.f32.mrb[19].mxu1 }
 0x205   :  { %v513_v36 = vpack.c.bf16 %v460_v35, %v456_v33 }
 0x207   :  { %1546 = vmatprep.subr.bf16.mxu0 %v513_v36 }
 0x208   :  { %1547 = vmatpush3.bf16.msra.mxu0 %v513_v36 }
 0x209   :  { %v1933_v37 = vpop.f32.mrb[20].mxu1 }
 0x20a   :  { %v466_v38 = vpop.f32.mrb[21].mxu1 }
 0x20b   :  { %v1935_v39 = vpop.f32.mrb[22].mxu1 }
 0x20c   :  { %v470_v40 = vpop.f32.mrb[23].mxu1 }
 0x20d   :  { %v514_v41 = vpack.c.bf16 %v470_v40, %v466_v38 }
 0x20f   :  { %1548 = vmatprep.subr.bf16.mxu0 %v514_v41 }
 0x210   :  { %1549 = vmatpush3.bf16.msra.mxu0 %v514_v41 }
 0x211   :  { %v1937_v42 = vpop.f32.mrb[24].mxu1 }
 0x212   :  { %v476_v43 = vpop.f32.mrb[25].mxu1 }
 0x213   :  { %v1939_v44 = vpop.f32.mrb[26].mxu1 }
 0x214   :  { %v480_v45 = vpop.f32.mrb[27].mxu1 }
 0x215   :  { %v515_v46 = vpack.c.bf16 %v480_v45, %v476_v43 }
 0x217   :  { %1550 = vmatprep.subr.bf16.mxu0 %v515_v46 }
 0x218   :  { %1551 = vmatpush3.bf16.msra.mxu0 %v515_v46 }
 0x219   :  { %v1941_v47 = vpop.f32.mrb[28].mxu1 }
 0x21a   :  { %v486_v48 = vpop.f32.mrb[29].mxu1 }
 0x21b   :  { %v1943_v49 = vpop.f32.mrb[30].mxu1 }
 0x21c   :  { %v490_v50 = vpop.f32.mrb[31].mxu1 }
 0x21d   :  { %v516_v51 = vpack.c.bf16 %v490_v50, %v486_v48 }
 0x21f   :  { %1552 = vmatprep.subr.bf16.mxu0 %v516_v51 }
 0x220   :  { %1553 = vmatpush3.bf16.msra.mxu0 %v516_v51 }
 0x221   :  { %854 = vmatprep.subr.bf16.mxu0 %v1688_v52 }
 0x223   :  { %1555 = vmatmul.mubr.bf16.vlgmr.msra.gmra.mrb[16].mxu0 %v1951_v53 }
 0x224   :  { %1558 = vmatprep.mubr.bf16.mxu0 %v1956_v54  ;;  %855 = vmatpush1.bf16.msra.mxu0 %v1686_v55 }
 0x225   :  { %856 = vmatprep.subr.bf16.mxu0 %v1691_v56 }
 0x228   :  { %857 = vmatpush1.bf16.msra.mxu0 %v1689_v57 }
 0x229   :  { %858 = vmatprep.subr.bf16.mxu0 %v1694_v58 }
 0x22b   :  { %1559 = vmatmul.mubr.bf16.gmra.mrb[20].mxu0 %v1975_v59 }
 0x22c   :  { %1562 = vmatprep.mubr.bf16.mxu0 %v1980_v60  ;;  %859 = vmatpush1.bf16.msra.mxu0 %v1692_v61 }
 0x22d   :  { %860 = vmatprep.subr.bf16.mxu0 %v1697_v62 }
 0x230   :  { %861 = vmatpush1.bf16.msra.mxu0 %v1695_v63 }
 0x231   :  { %862 = vmatprep.subr.bf16.mxu0 %v1700_v0 }
 0x233   :  { %1563 = vmatmul.mubr.bf16.gmra.mrb[24].mxu0 %v1999_v1 }
 0x234   :  { %1566 = vmatprep.mubr.bf16.mxu0 %v2004_v2  ;;  %863 = vmatpush1.bf16.msra.mxu0 %v1698_v3 }
 0x235   :  { %864 = vmatprep.subr.bf16.mxu0 %v1703_v5 }
 0x238   :  { %865 = vmatpush1.bf16.msra.mxu0 %v1701_v6 }
 0x239   :  { %866 = vmatprep.subr.bf16.mxu0 %v1706_v7 }
 0x23b   :  { %1567 = vmatmul.mubr.bf16.gmra.mrb[28].mxu0 %v2014_v4 }
 0x23c   :  { %886 = vmatprep.mubr.bf16.mxu0 %v1745_v32  ;;  %867 = vmatpush1.bf16.msra.mxu0 %v1704_v8 }
 0x23d   :  { %868 = vmatprep.subr.bf16.mxu0 %v1709_v9 }
 0x240   :  { %869 = vmatpush1.bf16.msra.mxu0 %v1707_v10 }
 0x2f6   :  { %v1556_v12 = vpop.f32.mrb[16].mxu0 }
 0x2f7   :  { %v664_v15 = vadd.f32 %v1556_v12, %v1917_v16  ;;  %v599_v17 = vpop.f32.mrb[17].mxu0 }
 0x2f8   :  { %v662_v19 = vadd.f32 %v599_v17, %v1913_v11  ;;  %v1557_v20 = vpop.f32.mrb[18].mxu0 }
 0x2f9   :  { %v687_v22 = vadd.f32 %v2039_v14, %v664_v15  ;;  %v665_v24 = vadd.f32 %v1557_v20, %v1919_v18  ;;  %v602_v25 = vpop.f32.mrb[19].mxu0 }
 0x2fa   :  { %v685_v27 = vadd.f32 %v2039_v14, %v662_v19  ;;  %v663_v29 = vadd.f32 %v602_v25, %v1915_v13 }
 0x2fb   :  { %v719_v30 = vmul.f32 0.01, %v687_v22  ;;  %v688_v33 = vadd.f32 %v2039_v14, %v665_v24  ;;  %vm703_vm0 = vcmp.gt.f32.partialorder %v687_v22, 0.0 }
 0x2fc   :  { %v717_v35 = vmul.f32 0.01, %v685_v27  ;;  %v686_v16 = vadd.f32 %v2039_v14, %v663_v29  ;;  %vm701_vm1 = vcmp.gt.f32.partialorder %v685_v27, 0.0 }
 0x2fd   :  { %vm704_vm2 = vcmp.gt.f32.partialorder %v688_v33, 0.0  ;;  %v720_v11 = vmul.f32 0.01, %v688_v33  ;;  %v735_v41 = vsel %vm703_vm0, %v687_v22, %v719_v30 }
 0x2fe   :  { %vm702_vm3 = vcmp.gt.f32.partialorder %v686_v16, 0.0  ;;  %v718_v36 = vmul.f32 0.01, %v686_v16  ;;  %v1560_v38 = vpop.f32.mrb[20].mxu0  ;;  %v733_v45 = vsel %vm701_vm1, %v685_v27, %v717_v35 }
 0x2ff   :  { %v668_v18 = vadd.f32 %v1560_v38, %v1925_v26  ;;  %v615_v40 = vpop.f32.mrb[21].mxu0  ;;  %v736_v43 = vsel %vm704_vm2, %v688_v33, %v720_v11 }
 0x300   :  { %v734_v13 = vsel %vm702_vm3, %v686_v16, %v718_v36  ;;  %v666_v46 = vadd.f32 %v615_v40, %v1921_v21  ;;  %v1561_v48 = vpop.f32.mrb[22].mxu0  ;;  %v750_v50 = vpack.c.bf16 %v736_v43, %v735_v41 }
 0x301   :  { %v749_v51 = vpack.c.bf16 %v734_v13, %v733_v45  ;;  %v691_v52 = vadd.f32 %v2039_v14, %v668_v18  ;;  %v669_v55 = vadd.f32 %v1561_v48, %v1927_v28  ;;  %v618_v56 = vpop.f32.mrb[23].mxu0 }
 0x302   :  { %v689_v57 = vadd.f32 %v2039_v14, %v666_v46  ;;  %v667_v58 = vadd.f32 %v618_v56, %v1923_v23 }
 0x303   :  { %v723_v26 = vmul.f32 0.01, %v691_v52  ;;  %v692_v61 = vadd.f32 %v2039_v14, %v669_v55  ;;  %887 = vmatmul.mubr.bf16.vlgmr.msra.gmra.mrb[32].mxu0 %v749_v51  ;;  %vm707_vm4 = vcmp.gt.f32.partialorder %v691_v52, 0.0 }
 0x304   :  { %v721_v62 = vmul.f32 0.01, %v689_v57  ;;  %v690_v21 = vadd.f32 %v2039_v14, %v667_v58  ;;  %896 = vmatprep.mubr.bf16.mxu0 %v1745_v32  ;;  %vm705_vm5 = vcmp.gt.f32.partialorder %v689_v57, 0.0 }
 0x305   :  { %vm708_vm6 = vcmp.gt.f32.partialorder %v692_v61, 0.0  ;;  %v724_v63 = vmul.f32 0.01, %v692_v61  ;;  %v739_v23 = vsel %vm707_vm4, %v691_v52, %v723_v26 }
 0x306   :  { %vm706_vm7 = vcmp.gt.f32.partialorder %v690_v21, 0.0  ;;  %v722_v28 = vmul.f32 0.01, %v690_v21  ;;  %v1564_v0 = vpop.f32.mrb[24].mxu0  ;;  %v737_v9 = vsel %vm705_vm5, %v689_v57, %v721_v62 }
 0x307   :  { %v672_v3 = vadd.f32 %v1564_v0, %v1933_v37  ;;  %v631_v5 = vpop.f32.mrb[25].mxu0  ;;  %v740_v6 = vsel %vm708_vm6, %v692_v61, %v724_v63 }
 0x308   :  { %v670_v7 = vadd.f32 %v631_v5, %v1929_v31  ;;  %v1565_v8 = vpop.f32.mrb[26].mxu0  ;;  %v738_v10 = vsel %vm706_vm7, %v690_v21, %v722_v28  ;;  %v752_v12 = vpack.c.bf16 %v740_v6, %v739_v23 }
 0x309   :  { %v695_v15 = vadd.f32 %v2039_v14, %v672_v3  ;;  %v673_v17 = vadd.f32 %v1565_v8, %v1935_v39  ;;  %v634_v19 = vpop.f32.mrb[27].mxu0  ;;  %v751_v20 = vpack.c.bf16 %v738_v10, %v737_v9 }
 0x30a   :  { %v693_v22 = vadd.f32 %v2039_v14, %v670_v7  ;;  %v671_v24 = vadd.f32 %v634_v19, %v1931_v34 }
 0x30b   :  { %v727_v37 = vmul.f32 0.01, %v695_v15  ;;  %v696_v25 = vadd.f32 %v2039_v14, %v673_v17  ;;  %897 = vmatmul.mubr.bf16.gmra.mrb[36].mxu0 %v750_v50  ;;  %vm711_vm8 = vcmp.gt.f32.partialorder %v695_v15, 0.0 }
 0x30c   :  { %v725_v31 = vmul.f32 0.01, %v693_v22  ;;  %v694_v27 = vadd.f32 %v2039_v14, %v671_v24  ;;  %906 = vmatprep.mubr.bf16.mxu0 %v1745_v32  ;;  %vm709_vm9 = vcmp.gt.f32.partialorder %v693_v22, 0.0 }
 0x30d   :  { %vm712_vm10 = vcmp.gt.f32.partialorder %v696_v25, 0.0  ;;  %v728_v29 = vmul.f32 0.01, %v696_v25  ;;  %v743_v34 = vsel %vm711_vm8, %v695_v15, %v727_v37 }
 0x30e   :  { %vm710_vm11 = vcmp.gt.f32.partialorder %v694_v27, 0.0  ;;  %v726_v39 = vmul.f32 0.01, %v694_v27  ;;  %v1568_v30 = vpop.f32.mrb[28].mxu0  ;;  %v741_v38 = vsel %vm709_vm9, %v693_v22, %v725_v31 }
 0x30f   :  { %v676_v33 = vadd.f32 %v1568_v30, %v1941_v47  ;;  %v647_v35 = vpop.f32.mrb[29].mxu0  ;;  %v744_v16 = vsel %vm712_vm10, %v696_v25, %v728_v29 }
 0x310   :  { %v674_v11 = vadd.f32 %v647_v35, %v1937_v42  ;;  %v1569_v36 = vpop.f32.mrb[30].mxu0  ;;  %v742_v18 = vsel %vm710_vm11, %v694_v27, %v726_v39  ;;  %v754_v40 = vpack.c.bf16 %v744_v16, %v743_v34 }
 0x311   :  { %v699_v41 = vadd.f32 %v2039_v14, %v676_v33  ;;  %v677_v43 = vadd.f32 %v1569_v36, %v1943_v49  ;;  %v650_v45 = vpop.f32.mrb[31].mxu0  ;;  %v753_v13 = vpack.c.bf16 %v742_v18, %v741_v38 }
 0x312   :  { %v697_v46 = vadd.f32 %v2039_v14, %v674_v11  ;;  %v675_v48 = vadd.f32 %v650_v45, %v1939_v44  ;;  %v1711_v45 = vld [vmem:[#allocation2 + $0x8] sm:$0xff]  }
 0x313   :  { %v731_v47 = vmul.f32 0.01, %v699_v41  ;;  %v700_v50 = vadd.f32 %v2039_v14, %v677_v43  ;;  %907 = vmatmul.mubr.bf16.gmra.mrb[40].mxu0 %v751_v20  ;;  %vm715_vm12 = vcmp.gt.f32.partialorder %v699_v41, 0.0  ;;  %v1710_v43 = vld [vmem:[#allocation2] sm:$0xff]  }
 0x314   :  { %v729_v42 = vmul.f32 0.01, %v697_v46  ;;  %v698_v51 = vadd.f32 %v2039_v14, %v675_v48  ;;  %916 = vmatprep.mubr.bf16.mxu0 %v1745_v32  ;;  %vm713_vm13 = vcmp.gt.f32.partialorder %v697_v46, 0.0  ;;  %v1714_v48 = vld [vmem:[#allocation2 + $0x20] sm:$0xff]  }
 0x315   :  { %vm716_vm14 = vcmp.gt.f32.partialorder %v700_v50, 0.0  ;;  %v732_v52 = vmul.f32 0.01, %v700_v50  ;;  %v747_v55 = vsel %vm715_vm12, %v699_v41, %v731_v47  ;;  %v2122_v47 = vld [vmem:[%s2212_s5 + $0x1] ss:$0 sm:$0xff] }
 0x316   :  { %vm714_vm15 = vcmp.gt.f32.partialorder %v698_v51, 0.0  ;;  %v730_v49 = vmul.f32 0.01, %v698_v51  ;;  %v745_v57 = vsel %vm713_vm13, %v697_v46, %v729_v42  ;;  %v1713_v46 = vld [vmem:[#allocation2 + $0x18] sm:$0xff]  }
 0x317   :  { %v748_v56 = vsel %vm716_vm14, %v700_v50, %v732_v52 }
 0x318   :  { %v746_v58 = vsel %vm714_vm15, %v698_v51, %v730_v49  ;;  %v756_v44 = vpack.c.bf16 %v748_v56, %v747_v55 }
 0x319   :  { %v755_v26 = vpack.c.bf16 %v746_v58, %v745_v57 }
 0x31b   :  { %917 = vmatmul.mubr.bf16.gmra.mrb[44].mxu0 %v752_v12 }
 0x31c   :  { %926 = vmatprep.mubr.bf16.mxu0 %v1745_v32 }
 0x323   :  { %927 = vmatmul.mubr.bf16.gmra.mrb[48].mxu0 %v753_v13  ;;  %v1712_v13 = vld [vmem:[#allocation2 + $0x10] sm:$0xff]  }
 0x324   :  { %936 = vmatprep.mubr.bf16.mxu0 %v1745_v32 }
 0x32b   :  { %937 = vmatmul.mubr.bf16.gmra.mrb[52].mxu0 %v754_v40 }
 0x32c   :  { %946 = vmatprep.mubr.bf16.mxu0 %v1745_v32 }
 0x333   :  { %947 = vmatmul.mubr.bf16.gmra.mrb[56].mxu0 %v755_v26 }
 0x334   :  { %956 = vmatprep.mubr.bf16.mxu0 %v1745_v32 }
 0x33b   :  { %957 = vmatmul.mubr.bf16.gmra.mrb[60].mxu0 %v756_v44 }
 0x3d6   :  { %v2080_v14 = vpop.f32.mrb[32].mxu0 }
 0x3d7   :  { %v890_v61 = vpop.f32.mrb[33].mxu0 }
 0x3d8   :  { %v2082_v62 = vpop.f32.mrb[34].mxu0 }
 0x3d9   :  { %v894_v21 = vpop.f32.mrb[35].mxu0 }
 0x3da   :  { %v967_v63 = vpack.c.bf16 %v894_v21, %v890_v61 }
 0x3dc   :  { %1570 = vmatprep.subr.bf16.mxu1 %v967_v63 }
 0x3dd   :  { %1571 = vmatpush3.bf16.msra.mxu1 %v967_v63 }
 0x3de   :  { %v2084_v28 = vpop.f32.mrb[36].mxu0 }
 0x3df   :  { %v900_v0 = vpop.f32.mrb[37].mxu0 }
 0x3e0   :  { %v2086_v3 = vpop.f32.mrb[38].mxu0 }
 0x3e1   :  { %v904_v5 = vpop.f32.mrb[39].mxu0 }
 0x3e2   :  { %v968_v23 = vpack.c.bf16 %v904_v5, %v900_v0 }
 0x3e4   :  { %1572 = vmatprep.subr.bf16.mxu1 %v968_v23 }
 0x3e5   :  { %1573 = vmatpush3.bf16.msra.mxu1 %v968_v23 }
 0x3e6   :  { %v2088_v32 = vpop.f32.mrb[40].mxu0 }
 0x3e7   :  { %v910_v6 = vpop.f32.mrb[41].mxu0 }
 0x3e8   :  { %v2090_v7 = vpop.f32.mrb[42].mxu0 }
 0x3e9   :  { %v914_v8 = vpop.f32.mrb[43].mxu0 }
 0x3ea   :  { %v969_v9 = vpack.c.bf16 %v914_v8, %v910_v6 }
 0x3ec   :  { %1574 = vmatprep.subr.bf16.mxu1 %v969_v9 }
 0x3ed   :  { %1575 = vmatpush3.bf16.msra.mxu1 %v969_v9 }
 0x3ee   :  { %v2092_v10 = vpop.f32.mrb[44].mxu0 }
 0x3ef   :  { %v920_v12 = vpop.f32.mrb[45].mxu0 }
 0x3f0   :  { %v2094_v15 = vpop.f32.mrb[46].mxu0 }
 0x3f1   :  { %v924_v17 = vpop.f32.mrb[47].mxu0 }
 0x3f2   :  { %v970_v19 = vpack.c.bf16 %v924_v17, %v920_v12 }
 0x3f4   :  { %1576 = vmatprep.subr.bf16.mxu1 %v970_v19 }
 0x3f5   :  { %1577 = vmatpush3.bf16.msra.mxu1 %v970_v19 }
 0x3f6   :  { %v2096_v20 = vpop.f32.mrb[48].mxu0 }
 0x3f7   :  { %v930_v22 = vpop.f32.mrb[49].mxu0 }
 0x3f8   :  { %v2098_v24 = vpop.f32.mrb[50].mxu0 }
 0x3f9   :  { %v934_v37 = vpop.f32.mrb[51].mxu0 }
 0x3fa   :  { %v971_v25 = vpack.c.bf16 %v934_v37, %v930_v22 }
 0x3fc   :  { %1578 = vmatprep.subr.bf16.mxu1 %v971_v25 }
 0x3fd   :  { %1579 = vmatpush3.bf16.msra.mxu1 %v971_v25 }
 0x3fe   :  { %v2100_v31 = vpop.f32.mrb[52].mxu0 }
 0x3ff   :  { %v940_v27 = vpop.f32.mrb[53].mxu0 }
 0x400   :  { %v2102_v29 = vpop.f32.mrb[54].mxu0 }
 0x401   :  { %v944_v39 = vpop.f32.mrb[55].mxu0 }
 0x402   :  { %v972_v30 = vpack.c.bf16 %v944_v39, %v940_v27 }
 0x404   :  { %1580 = vmatprep.subr.bf16.mxu1 %v972_v30 }
 0x405   :  { %1581 = vmatpush3.bf16.msra.mxu1 %v972_v30 }
 0x406   :  { %v2104_v33 = vpop.f32.mrb[56].mxu0 }
 0x407   :  { %v950_v35 = vpop.f32.mrb[57].mxu0 }
 0x408   :  { %v2106_v34 = vpop.f32.mrb[58].mxu0 }
 0x409   :  { %v954_v16 = vpop.f32.mrb[59].mxu0 }
 0x40a   :  { %v973_v11 = vpack.c.bf16 %v954_v16, %v950_v35 }
 0x40c   :  { %1582 = vmatprep.subr.bf16.mxu1 %v973_v11 }
 0x40d   :  { %1583 = vmatpush3.bf16.msra.mxu1 %v973_v11 }
 0x40e   :  { %v2108_v36 = vpop.f32.mrb[60].mxu0 }
 0x40f   :  { %v960_v38 = vpop.f32.mrb[61].mxu0 }
 0x410   :  { %v2110_v18 = vpop.f32.mrb[62].mxu0 }
 0x411   :  { %v964_v40 = vpop.f32.mrb[63].mxu0 }
 0x412   :  { %v974_v41 = vpack.c.bf16 %v964_v40, %v960_v38 }
 0x414   :  { %1584 = vmatprep.subr.bf16.mxu1 %v974_v41 }
 0x415   :  { %1585 = vmatpush3.bf16.msra.mxu1 %v974_v41 }
 0x416   :  { %1602 = vmatprep.subr.bf16.mxu1 %v1710_v43 }
 0x418   :  { %1587 = vmatmul.mubr.bf16.vlgmr.msra.gmra.mrb[32].mxu1 %v1951_v53  ;;  %v1715_v53 = vld [vmem:[#allocation2 + $0x28] sm:$0xff]  }
 0x419   :  { %1590 = vmatprep.mubr.bf16.mxu1 %v1956_v54  ;;  %1603 = vmatpush3.bf16.msra.mxu1 %v1710_v43  ;;  %v1716_v54 = vld [vmem:[#allocation2 + $0x30] sm:$0xff]  }
 0x41a   :  { %1604 = vmatprep.subr.bf16.mxu1 %v1711_v45 }
 0x41d   :  { %1605 = vmatpush3.bf16.msra.mxu1 %v1711_v45 }
 0x41e   :  { %1606 = vmatprep.subr.bf16.mxu1 %v1712_v13 }
 0x420   :  { %1591 = vmatmul.mubr.bf16.gmra.mrb[36].mxu1 %v1975_v59  ;;  %v1717_v59 = vld [vmem:[#allocation2 + $0x38] sm:$0xff]  }
 0x421   :  { %1594 = vmatprep.mubr.bf16.mxu1 %v1980_v60  ;;  %1607 = vmatpush3.bf16.msra.mxu1 %v1712_v13 }
 0x422   :  { %1608 = vmatprep.subr.bf16.mxu1 %v1713_v46 }
 0x425   :  { %1609 = vmatpush3.bf16.msra.mxu1 %v1713_v46 }
 0x426   :  { %1610 = vmatprep.subr.bf16.mxu1 %v1714_v48 }
 0x428   :  { %1595 = vmatmul.mubr.bf16.gmra.mrb[40].mxu1 %v1999_v1 }
 0x429   :  { %1598 = vmatprep.mubr.bf16.mxu1 %v2004_v2  ;;  %1611 = vmatpush3.bf16.msra.mxu1 %v1714_v48 }
 0x42a   :  { %1612 = vmatprep.subr.bf16.mxu1 %v1715_v53 }
 0x42d   :  { %1613 = vmatpush3.bf16.msra.mxu1 %v1715_v53 }
 0x42e   :  { %1614 = vmatprep.subr.bf16.mxu1 %v1716_v54 }
 0x430   :  { %1599 = vmatmul.mubr.bf16.gmra.mrb[44].mxu1 %v2014_v4 }
 0x431   :  { %1615 = vmatpush3.bf16.msra.mxu1 %v1716_v54 }
 0x432   :  { %1616 = vmatprep.subr.bf16.mxu1 %v1717_v59 }
 0x435   :  { %1617 = vmatpush3.bf16.msra.mxu1 %v1717_v59 }
 0x4eb   :  { %v1588_v60 = vpop.f32.mrb[32].mxu1 }
 0x4ec   :  { %v1074_v1 = vadd.f32 %v1588_v60, %v2084_v28  ;;  %v1009_v2 = vpop.f32.mrb[33].mxu1 }
 0x4ed   :  { %v1072_v4 = vadd.f32 %v1009_v2, %v2080_v14  ;;  %v1589_v50 = vpop.f32.mrb[34].mxu1 }
 0x4ee   :  { %v1098_v42 = vadd.f32 %v2122_v47, %v1074_v1  ;;  %v1075_v51 = vadd.f32 %v1589_v50, %v2086_v3  ;;  %v1012_v52 = vpop.f32.mrb[35].mxu1 }
 0x4ef   :  { %v1096_v49 = vadd.f32 %v2122_v47, %v1072_v4  ;;  %v1073_v55 = vadd.f32 %v1012_v52, %v2082_v62 }
 0x4f0   :  { %v1130_v56 = vmul.f32 0.01, %v1098_v42  ;;  %v1099_v57 = vadd.f32 %v2122_v47, %v1075_v51  ;;  %vm1114_vm0 = vcmp.gt.f32.partialorder %v1098_v42, 0.0 }
 0x4f1   :  { %v1128_v58 = vmul.f32 0.01, %v1096_v49  ;;  %v1097_v44 = vadd.f32 %v2122_v47, %v1073_v55  ;;  %vm1112_vm1 = vcmp.gt.f32.partialorder %v1096_v49, 0.0 }
 0x4f2   :  { %vm1115_vm2 = vcmp.gt.f32.partialorder %v1099_v57, 0.0  ;;  %v1131_v26 = vmul.f32 0.01, %v1099_v57  ;;  %v1146_v21 = vsel %vm1114_vm0, %v1098_v42, %v1130_v56 }
 0x4f3   :  { %vm1113_vm3 = vcmp.gt.f32.partialorder %v1097_v44, 0.0  ;;  %v1129_v14 = vmul.f32 0.01, %v1097_v44  ;;  %v1592_v61 = vpop.f32.mrb[36].mxu1  ;;  %v1144_v23 = vsel %vm1112_vm1, %v1096_v49, %v1128_v58 }
 0x4f4   :  { %v1147_v63 = vsel %vm1115_vm2, %v1099_v57, %v1131_v26  ;;  %v1078_v28 = vadd.f32 %v1592_v61, %v2092_v10  ;;  %v1025_v0 = vpop.f32.mrb[37].mxu1 }
 0x4f5   :  { %v1161_v3 = vpack.c.bf16 %v1147_v63, %v1146_v21  ;;  %v1076_v62 = vadd.f32 %v1025_v0, %v2088_v32  ;;  %v1593_v5 = vpop.f32.mrb[38].mxu1  ;;  %v1145_v6 = vsel %vm1113_vm3, %v1097_v44, %v1129_v14 }
 0x4f6   :  { %v1102_v8 = vadd.f32 %v2122_v47, %v1078_v28  ;;  %v1079_v9 = vadd.f32 %v1593_v5, %v2094_v15  ;;  %v1028_v12 = vpop.f32.mrb[39].mxu1  ;;  %v1160_v17 = vpack.c.bf16 %v1145_v6, %v1144_v23  ;;  %v1433_v6 = vld [vmem:[%s2214_s7] ss:$0 sm:$0xff] }
 0x4f7   :  { %v1100_v19 = vadd.f32 %v2122_v47, %v1076_v62  ;;  %v1077_v22 = vadd.f32 %v1028_v12, %v2090_v7 }
 0x4f8   :  { %v1134_v37 = vmul.f32 0.01, %v1102_v8  ;;  %v1103_v10 = vadd.f32 %v2122_v47, %v1079_v9  ;;  %1618 = vmatprep.mubr.bf16.mxu1 %v1160_v17  ;;  %vm1118_vm4 = vcmp.gt.f32.partialorder %v1102_v8, 0.0 }
 0x4f9   :  { %v1132_v25 = vmul.f32 0.01, %v1100_v19  ;;  %v1101_v32 = vadd.f32 %v2122_v47, %v1077_v22  ;;  %1619 = vmatmul.mubr.bf16.vlgmr.msra.gmra.mrb[48].mxu1 %v1161_v3  ;;  %vm1116_vm5 = vcmp.gt.f32.partialorder %v1100_v19, 0.0 }
 0x4fa   :  { %vm1119_vm6 = vcmp.gt.f32.partialorder %v1103_v10, 0.0  ;;  %v1135_v27 = vmul.f32 0.01, %v1103_v10  ;;  %v1150_v16 = vsel %vm1118_vm4, %v1102_v8, %v1134_v37 }
 0x4fb   :  { %vm1117_vm7 = vcmp.gt.f32.partialorder %v1101_v32, 0.0  ;;  %v1133_v15 = vmul.f32 0.01, %v1101_v32  ;;  %v1596_v39 = vpop.f32.mrb[40].mxu1  ;;  %v1148_v40 = vsel %vm1116_vm5, %v1100_v19, %v1132_v25 }
 0x4fc   :  { %v1082_v30 = vadd.f32 %v1596_v39, %v2100_v31  ;;  %v1041_v35 = vpop.f32.mrb[41].mxu1  ;;  %v1151_v7 = vsel %vm1119_vm6, %v1103_v10, %v1135_v27 }
 0x4fd   :  { %v1080_v11 = vadd.f32 %v1041_v35, %v2096_v20  ;;  %v1597_v38 = vpop.f32.mrb[42].mxu1  ;;  %v1149_v41 = vsel %vm1117_vm7, %v1101_v32, %v1133_v15  ;;  %v1163_v43 = vpack.c.bf16 %v1151_v7, %v1150_v16 }
 0x4fe   :  { %v1106_v45 = vadd.f32 %v2122_v47, %v1082_v30  ;;  %v1083_v13 = vadd.f32 %v1597_v38, %v2102_v29  ;;  %v1044_v46 = vpop.f32.mrb[43].mxu1  ;;  %v1162_v48 = vpack.c.bf16 %v1149_v41, %v1148_v40 }
 0x4ff   :  { %v1104_v53 = vadd.f32 %v2122_v47, %v1080_v11  ;;  %v1081_v54 = vadd.f32 %v1044_v46, %v2098_v24 }
 0x500   :  { %v1138_v31 = vmul.f32 0.01, %v1106_v45  ;;  %v1107_v59 = vadd.f32 %v2122_v47, %v1083_v13  ;;  %1622 = vmatprep.mubr.bf16.mxu1 %v1162_v48  ;;  %vm1122_vm8 = vcmp.gt.f32.partialorder %v1106_v45, 0.0 }
 0x501   :  { %v1136_v20 = vmul.f32 0.01, %v1104_v53  ;;  %v1105_v60 = vadd.f32 %v2122_v47, %v1081_v54  ;;  %1623 = vmatmul.mubr.bf16.gmra.mrb[52].mxu1 %v1163_v43  ;;  %vm1120_vm9 = vcmp.gt.f32.partialorder %v1104_v53, 0.0 }
 0x502   :  { %vm1123_vm10 = vcmp.gt.f32.partialorder %v1107_v59, 0.0  ;;  %v1139_v1 = vmul.f32 0.01, %v1107_v59  ;;  %v1154_v42 = vsel %vm1122_vm8, %v1106_v45, %v1138_v31 }
 0x503   :  { %vm1121_vm11 = vcmp.gt.f32.partialorder %v1105_v60, 0.0  ;;  %v1137_v29 = vmul.f32 0.01, %v1105_v60  ;;  %v1600_v2 = vpop.f32.mrb[44].mxu1  ;;  %v1152_v49 = vsel %vm1120_vm9, %v1104_v53, %v1136_v20 }
 0x504   :  { %v1086_v4 = vadd.f32 %v1600_v2, %v2108_v36  ;;  %v1057_v50 = vpop.f32.mrb[45].mxu1  ;;  %v1155_v24 = vsel %vm1123_vm10, %v1107_v59, %v1139_v1 }
 0x505   :  { %v1084_v51 = vadd.f32 %v1057_v50, %v2104_v33  ;;  %v1601_v52 = vpop.f32.mrb[46].mxu1  ;;  %v1153_v55 = vsel %vm1121_vm11, %v1105_v60, %v1137_v29  ;;  %v1165_v56 = vpack.c.bf16 %v1155_v24, %v1154_v42 }
 0x506   :  { %v1110_v57 = vadd.f32 %v2122_v47, %v1086_v4  ;;  %v1087_v58 = vadd.f32 %v1601_v52, %v2110_v18  ;;  %v1060_v44 = vpop.f32.mrb[47].mxu1  ;;  %v1164_v26 = vpack.c.bf16 %v1153_v55, %v1152_v49 }
 0x507   :  { %v1108_v14 = vadd.f32 %v2122_v47, %v1084_v51  ;;  %v1085_v61 = vadd.f32 %v1060_v44, %v2106_v34 }
 0x508   :  { %v1142_v36 = vmul.f32 0.01, %v1110_v57  ;;  %v1111_v21 = vadd.f32 %v2122_v47, %v1087_v58  ;;  %1626 = vmatprep.mubr.bf16.mxu1 %v1164_v26  ;;  %vm1126_vm12 = vcmp.gt.f32.partialorder %v1110_v57, 0.0 }
 0x509   :  { %v1140_v33 = vmul.f32 0.01, %v1108_v14  ;;  %v1109_v63 = vadd.f32 %v2122_v47, %v1085_v61  ;;  %1627 = vmatmul.mubr.bf16.gmra.mrb[56].mxu1 %v1165_v56  ;;  %vm1124_vm13 = vcmp.gt.f32.partialorder %v1108_v14, 0.0 }
 0x50a   :  { %vm1127_vm14 = vcmp.gt.f32.partialorder %v1111_v21, 0.0  ;;  %v1143_v28 = vmul.f32 0.01, %v1111_v21  ;;  %v1158_v0 = vsel %vm1126_vm12, %v1110_v57, %v1142_v36 }
 0x50b   :  { %vm1125_vm15 = vcmp.gt.f32.partialorder %v1109_v63, 0.0  ;;  %v1141_v18 = vmul.f32 0.01, %v1109_v63  ;;  %v1156_v62 = vsel %vm1124_vm13, %v1108_v14, %v1140_v33 }
 0x50c   :  { %v1159_v3 = vsel %vm1127_vm14, %v1111_v21, %v1143_v28 }
 0x50d   :  { %v1157_v5 = vsel %vm1125_vm15, %v1109_v63, %v1141_v18  ;;  %v1167_v23 = vpack.c.bf16 %v1159_v3, %v1158_v0 }
 0x50e   :  { %v1166_v34 = vpack.c.bf16 %v1157_v5, %v1156_v62 }
 0x510   :  { %1630 = vmatprep.mubr.bf16.mxu1 %v1166_v34 }
 0x511   :  { %1631 = vmatmul.mubr.bf16.gmra.mrb[60].mxu1 %v1167_v23 }
 0x5cc   :  { %v1620_v8 = vpop.f32.mrb[48].mxu1 }
 0x5cd   :  { %v1282_v47 = vadd.f32 %v1620_v8, %v1433_v6  ;;  %v1273_v9 = vpop.f32.mrb[49].mxu1 }
 0x5ce   :  { %v1274_v12 = vadd.f32 %v1433_v6, %v1273_v9  ;;  %v1621_v17 = vpop.f32.mrb[50].mxu1 }
 0x5cf   :  { %1338 = vst [vmem:[%s2215_s8 + $0x10] sm:$0xff] %v1282_v47  ;;  %v1285_v19 = vadd.f32 %v1621_v17, %v1433_v6  ;;  %v1276_v22 = vpop.f32.mrb[51].mxu1 }
 0x5d0   :  { %1336 = vst [vmem:[%s2215_s8] sm:$0xff] %v1274_v12  ;;  %v1277_v37 = vadd.f32 %v1433_v6, %v1276_v22 }
 0x5d1   :  { %1339 = vst [vmem:[%s2215_s8 + $0x18] sm:$0xff] %v1285_v19 }
 0x5d2   :  { %1337 = vst [vmem:[%s2215_s8 + $0x8] sm:$0xff] %v1277_v37 }
 0x5d4   :  { %v1624_v10 = vpop.f32.mrb[52].mxu1 }
 0x5d5   :  { %v1298_v25 = vadd.f32 %v1624_v10, %v1433_v6  ;;  %v1289_v32 = vpop.f32.mrb[53].mxu1 }
 0x5d6   :  { %v1290_v27 = vadd.f32 %v1433_v6, %v1289_v32  ;;  %v1625_v15 = vpop.f32.mrb[54].mxu1 }
 0x5d7   :  { %1342 = vst [vmem:[%s2215_s8 + $0x30] sm:$0xff] %v1298_v25  ;;  %v1301_v39 = vadd.f32 %v1625_v15, %v1433_v6  ;;  %v1292_v30 = vpop.f32.mrb[55].mxu1 }
 0x5d8   :  { %1340 = vst [vmem:[%s2215_s8 + $0x20] sm:$0xff] %v1290_v27  ;;  %v1293_v35 = vadd.f32 %v1433_v6, %v1292_v30 }
 0x5d9   :  { %1343 = vst [vmem:[%s2215_s8 + $0x38] sm:$0xff] %v1301_v39 }
 0x5da   :  { %1341 = vst [vmem:[%s2215_s8 + $0x28] sm:$0xff] %v1293_v35 }
 0x5dc   :  { %v1628_v16 = vpop.f32.mrb[56].mxu1 }
 0x5dd   :  { %v1314_v7 = vadd.f32 %v1628_v16, %v1433_v6  ;;  %v1305_v11 = vpop.f32.mrb[57].mxu1 }
 0x5de   :  { %v1306_v38 = vadd.f32 %v1433_v6, %v1305_v11  ;;  %v1629_v40 = vpop.f32.mrb[58].mxu1 }
 0x5df   :  { %1346 = vst [vmem:[%s2215_s8 + $0x50] sm:$0xff] %v1314_v7  ;;  %v1317_v41 = vadd.f32 %v1629_v40, %v1433_v6  ;;  %v1308_v43 = vpop.f32.mrb[59].mxu1 }
 0x5e0   :  { %1344 = vst [vmem:[%s2215_s8 + $0x40] sm:$0xff] %v1306_v38  ;;  %v1309_v45 = vadd.f32 %v1433_v6, %v1308_v43 }
 0x5e1   :  { %1347 = vst [vmem:[%s2215_s8 + $0x58] sm:$0xff] %v1317_v41 }
 0x5e2   :  { %1345 = vst [vmem:[%s2215_s8 + $0x48] sm:$0xff] %v1309_v45 }
 0x5e4   :  { %v1632_v13 = vpop.f32.mrb[60].mxu1 }
 0x5e5   :  { %v1330_v46 = vadd.f32 %v1632_v13, %v1433_v6  ;;  %v1321_v48 = vpop.f32.mrb[61].mxu1 }
 0x5e6   :  { %v1322_v53 = vadd.f32 %v1433_v6, %v1321_v48  ;;  %v1633_v54 = vpop.f32.mrb[62].mxu1 }
 0x5e7   :  { %1350 = vst [vmem:[%s2215_s8 + $0x70] sm:$0xff] %v1330_v46  ;;  %v1333_v31 = vadd.f32 %v1633_v54, %v1433_v6  ;;  %v1324_v59 = vpop.f32.mrb[63].mxu1 }
 0x5e8   :  { %1348 = vst [vmem:[%s2215_s8 + $0x60] sm:$0xff] %v1322_v53  ;;  %v1325_v20 = vadd.f32 %v1433_v6, %v1324_v59 }
 0x5e9   :  { %1351 = vst [vmem:[%s2215_s8 + $0x78] sm:$0xff] %v1333_v31 }
 0x5ea   :  { %1349 = vst [vmem:[%s2215_s8 + $0x68] sm:$0xff] %v1325_v20 }
 0x5eb   :  { %1356 = vsyncpa [#allocation3], 1 }

</bundles_post_ra>
